<compile_context>
chip_gen: v6e
topology: v6e:2x2x1
jax: 0.10.0
libtpu: 0.0.40
codegen_flags: <defaults>
</compile_context>

<pallas_src>
import functools

import jax
import jax.numpy as jnp
from jax import lax
from jax.experimental import pallas as pl
from jax.experimental.pallas import tpu as pltpu


def _round_up(x, m):
    return ((x + m - 1) // m) * m


def _vmem_capacity_bytes():
    """Physical VMEM of the local TensorCore (fallback: 128 MiB)."""
    try:
        info = pltpu.get_tpu_info()
        cap = getattr(info, "vmem_capacity_bytes", None)
        if cap:
            return int(cap)
    except Exception:
        pass
    return 128 << 20


# ----------------------------------------------------------------------------
# Kernels
# ----------------------------------------------------------------------------
def _ff_mean_tiled_kernel(
    x_ref, o_ref, acc_ref, *, total_n, tile_n, tiles_per_split, ragged
):
    """ReLU + running row-sum over node tiles; per-split partial sum at the end.

    Grid is (node_splits [parallel], node_tiles [arbitrary/reduction]).
    acc_ref is (32, F): hot loop is pure full-vreg VALU adds with 4-way ILP;
    the 32->1 cross-sublane reduce happens only in the finalize.
    """
    i = pl.program_id(1)  # reduction (node-tile) axis -- last grid dim

    @pl.when(i == 0)
    def _():
        acc_ref[...] = jnp.zeros_like(acc_ref)

    a = jnp.maximum(x_ref[...].astype(jnp.float32), 0.0)  # ReLU
    acc_rows = acc_ref.shape[0]
    feat = a.shape[-1]

    def fold(v):
        # (tile_n, F) -> (tile_n//32, 32, F), sum over the leading axis:
        # sublane-major regroup only (tile-aligned) -> layout no-op.
        return jnp.sum(v.reshape(tile_n // acc_rows, acc_rows, feat), axis=0)

    if not ragged:
        # Grid covers exactly N rows: no masking anywhere on the hot path.
        acc_ref[...] += fold(a)
    else:
        base = (pl.program_id(0) * tiles_per_split + i) * tile_n

        @pl.when(base + tile_n <= total_n)
        def _():  # interior tile: unmasked fast path
            acc_ref[...] += fold(a)

        @pl.when(base + tile_n > total_n)
        def _():  # boundary / duplicate tile: mask rows >= N (after ReLU)
            row = base + lax.broadcasted_iota(jnp.int32, a.shape, 0)
            acc_ref[...] += fold(jnp.where(row < total_n, a, 0.0))

    @pl.when(i == pl.num_programs(1) - 1)
    def _():
        # Per-split partial sum (f32); the mean is finished in a tiny epilogue.
        o_ref[...] = jnp.sum(acc_ref[...], axis=0, keepdims=True)[None]


def _ff_mean_single_kernel(x_ref, o_ref, *, total_n):
    """Single-block path for tiny inputs: no grid, no scratch."""
    a = jnp.maximum(x_ref[...].astype(jnp.float32), 0.0)
    o_ref[...] = jnp.sum(a, axis=0, keepdims=True) * (1.0 / float(total_n))


# ----------------------------------------------------------------------------
# Wrapper
# ----------------------------------------------------------------------------
def feedforward_block_forward(
    x,
    num_go_labels,
    go_dim,
    *,
    tile_n=None,
    vmem_budget_bytes=8 << 20,   # per input buffer (Pallas double-buffers it)
    num_core_splits=2,           # node-axis split for 2-TC chips (v7x)
):
    """x: (N, num_go_labels * go_dim), float32 or bfloat16.

    Returns (num_go_labels, go_dim) = mean over nodes of relu(x), matching the
    reference forward() for a single graph (data.batch all zeros).
    """
    n, f = x.shape
    assert f == num_go_labels * go_dim
    itemsize = jnp.dtype(x.dtype).itemsize
    row_bytes = f * itemsize

    # --- tiny-input fast path: one block, no grid / scratch ------------------
    if tile_n is None and n * row_bytes <= (1 << 21):
        out = pl.pallas_call(
            functools.partial(_ff_mean_single_kernel, total_n=n),
            out_shape=jax.ShapeDtypeStruct((1, f), jnp.float32),
        )(x)
        return out.astype(x.dtype).reshape(num_go_labels, go_dim)

    ACC_ROWS = 32  # accumulator sublanes: mult of 8/16/32 (f32/bf16/int8 packing)

    # --- VMEM limit cap: leave headroom below physical capacity --------------
    limit_cap = min(48 << 20, (_vmem_capacity_bytes() * 3) // 4)

    # --- row tile sized by bytes, full feature width (no padding, no split) --
    # TODO(synk): if ACC_ROWS * F alone exceeds the VMEM budget (enormous F),
    # a feature-split path would be needed; not implemented here.
    if tile_n is None:
        tile_n = max(ACC_ROWS, ((vmem_budget_bytes // row_bytes) // ACC_ROWS) * ACC_ROWS)
        avail = max(0, limit_cap - (ACC_ROWS * f * 4 + 2 * f * 4) - (4 << 20))
        max_rows = max(ACC_ROWS, ((avail // 2) // row_bytes // ACC_ROWS) * ACC_ROWS)
        tile_n = min(tile_n, max_rows, _round_up(n, ACC_ROWS))
    assert tile_n % ACC_ROWS == 0, "tile_n must be a multiple of 32"

    total_tiles = pl.cdiv(n, tile_n)
    num_splits = (
        num_core_splits
        if (num_core_splits > 1 and total_tiles >= 2 * num_core_splits)
        else 1
    )
    tiles_per_split = pl.cdiv(total_tiles, num_splits)
    # ragged: grid rows != N (partial last tile and/or one duplicate clamped tile)
    ragged = (num_splits * tiles_per_split * tile_n) != n

    def x_map(p, i):
        t = p * tiles_per_split + i
        if num_splits > 1:
            # ceil-split may overshoot by one tile; clamp so the DMA stays in
            # bounds (the duplicate tile is fully masked out in the kernel).
            t = jnp.minimum(t, total_tiles - 1)
        return (t, 0)

    need = 2 * tile_n * row_bytes + ACC_ROWS * f * 4 + 2 * f * 4
    vmem_limit = int(min(limit_cap, max(16 << 20, need + (2 << 20))))

    kernel = functools.partial(
        _ff_mean_tiled_kernel,
        total_n=n,
        tile_n=tile_n,
        tiles_per_split=tiles_per_split,
        ragged=ragged,
    )

    partials = pl.pallas_call(
        kernel,
        out_shape=jax.ShapeDtypeStruct((num_splits, 1, f), jnp.float32),
        grid_spec=pltpu.PrefetchScalarGridSpec(
            num_scalar_prefetch=0,
            grid=(num_splits, tiles_per_split),   # reduction (node) axis last
            in_specs=[pl.BlockSpec((tile_n, f), x_map)],
            out_specs=pl.BlockSpec((1, 1, f), lambda p, i: (p, 0, 0)),
            scratch_shapes=[pltpu.VMEM((ACC_ROWS, f), jnp.float32)],
        ),
        compiler_params=pltpu.CompilerParams(
            dimension_semantics=("parallel", "arbitrary"),
            vmem_limit_bytes=vmem_limit,
        ),
    )(x)

    # Tiny XLA epilogue: add the per-split partial sums, finish the mean.
    out = partials.sum(axis=(0, 1)) * (1.0 / float(n))
    return out.astype(x.dtype).reshape(num_go_labels, go_dim)


def init_linear_params(key, fc_units):
    """Mirror of the nn.Linear stack declared in __init__.

    NOTE: the reference forward() never applies these layers (it re-reads
    data.x inside the loop), so they do not affect the output.
    """
    params = []
    for i in range(len(fc_units) - 1):
        key, wk, bk = jax.random.split(key, 3)
        bound = 1.0 / (fc_units[i] ** 0.5)
        w = jax.random.uniform(wk, (fc_units[i + 1], fc_units[i]),
                               minval=-bound, maxval=bound, dtype=jnp.float32)
        b = jax.random.uniform(bk, (fc_units[i + 1],),
                               minval=-bound, maxval=bound, dtype=jnp.float32)
        params.append((w, b))
    return params


# ----------------------------------------------------------------------------
# Demo / self-check
# ----------------------------------------------------------------------------
if __name__ == "__main__":
    key = jax.random.PRNGKey(0)

    def reference(xr, labels, dim):
        a = jnp.maximum(xr.astype(jnp.float32), 0.0)
        return a.reshape(-1, labels, dim).mean(axis=0)

    # Linear params exist in the module but are never applied by forward().
    _ = init_linear_params(key, [128, 32, 128])

    # --- Test A: tiny input, F=80 (NOT a multiple of 128, no padding needed) -
    key, k = jax.random.split(key)
    x_a = jax.random.normal(k, (50, 8 * 10), dtype=jnp.float32)
    out_a = jax.block_until_ready(feedforward_block_forward(x_a, 8, 10))
    assert out_a.shape == (8, 10)
    assert jnp.allclose(out_a, reference(x_a, 8, 10), atol=1e-4, rtol=1e-4)

    # --- Test B: tiled path, ragged N, 2-way node split ----------------------
    key, k = jax.random.split(key)
    x_b = jax.random.normal(k, (1000, 128), dtype=jnp.float32)
    out_b = jax.block_until_ready(feedforward_block_forward(x_b, 8, 16, tile_n=128))
    assert out_b.shape == (8, 16)
    assert jnp.allclose(out_b, reference(x_b, 8, 16), atol=1e-4, rtol=1e-4)

    # --- Test C: odd tile count -> clamped duplicate tile, fully masked ------
    out_c = jax.block_until_ready(feedforward_block_forward(x_b, 8, 16, tile_n=160))
    assert jnp.allclose(out_c, reference(x_b, 8, 16), atol=1e-4, rtol=1e-4)

    # --- Test D: bf16 streamed as-is (f32 accumulation inside) ---------------
    x_d = x_b.astype(jnp.bfloat16)
    out_d = jax.block_until_ready(feedforward_block_forward(x_d, 8, 16, tile_n=128))
    assert jnp.allclose(out_d.astype(jnp.float32), reference(x_d, 8, 16),
                        atol=2e-2, rtol=2e-2)

    # --- Test E: auto byte-sized tile (one big tile), ragged N ---------------
    key, k = jax.random.split(key)
    x_e = jax.random.normal(k, (5000, 256), dtype=jnp.float32)
    out_e = jax.block_until_ready(feedforward_block_forward(x_e, 16, 16))
    assert out_e.shape == (16, 16)
    assert jnp.allclose(out_e, reference(x_e, 16, 16), atol=1e-4, rtol=1e-4)

    # TODO(synk): multi-graph MeanAggregation (data.batch with >1 segment) is
    # not implemented; the reference's final .view(num_go_labels, go_dim)
    # implies a single graph anyway.
    print("KERNEL_OK")
</pallas_src>

<mosaic_0001>
module attributes {stable_mosaic.version = 11 : i64} {
  func.func @_ff_mean_single_kernel(%arg0: memref<50x80xf32, #tpu.memory_space<vmem>>, %arg1: memref<1x80xf32, #tpu.memory_space<vmem>>) attributes {dimension_semantics = [], scalar_prefetch = 0 : i64, scratch_operands = 0 : i64, tpu.core_type = #tpu.core_type<tc>} {
    %c0 = arith.constant 0 : index
    %c0_0 = arith.constant 0 : index
    %0 = vector.load %arg0[%c0, %c0_0] : memref<50x80xf32, #tpu.memory_space<vmem>>, vector<50x80xf32>
    %cst = arith.constant 0.000000e+00 : f32
    %1 = vector.broadcast %cst : f32 to vector<50x80xf32>
    %2 = arith.maximumf %0, %1 : vector<50x80xf32>
    %cst_1 = arith.constant dense<0.000000e+00> : vector<80xf32>
    %3 = vector.multi_reduction <add>, %2, %cst_1 [0] : vector<50x80xf32> to vector<80xf32>
    %4 = vector.shape_cast %3 : vector<80xf32> to vector<1x80xf32>
    %cst_2 = arith.constant 2.000000e-02 : f32
    %5 = vector.broadcast %cst_2 : f32 to vector<1x80xf32>
    %6 = arith.mulf %4, %5 : vector<1x80xf32>
    %c0_3 = arith.constant 0 : index
    %c0_4 = arith.constant 0 : index
    %7 = vector.load %arg1[%c0_3, %c0_4] : memref<1x80xf32, #tpu.memory_space<vmem>>, vector<1x80xf32>
    tpu.vector_store %arg1[%c0_3, %c0_4], %6 {strides = array<i32>} : memref<1x80xf32, #tpu.memory_space<vmem>>, vector<1x80xf32>,
    return
  }
}

</mosaic_0001>

<bundles_post_ra>
// kernel: tpu_custom_call.1
= control target key start
LH: loop header
LB: loop body
LE: loop exit
PB: predicated region body
PF: predicated region fallthrough
CT: control target
= control target key end

     0   :  { %6 = vsyncpa [#allocation3], 0  ;;  %s150_s0 = inlined_call_operand.hbm [shape: f32[50,80], index: 0, kind: input, shape index: {}]   ;;  %s151_s1 = inlined_call_operand.hbm [shape: f32[1,80], index: 1, kind: output, shape index: {}]  }
   0x1   :  { %7 = vsyncpa [#allocation4], 0  ;;  %s124_s6 = smov [#allocation2]  }
   0x2   :  { %s13_s7 = sshll.u32 %s124_s6, 4  ;;  %s14_s7 = int_to_ptr.vmem [resolvable:$true] %s13_s7 }
   0x3   :  { %s88_s8 = scalar_lea.vmem %s14_s7, 896  ;;  %p93_p1 = scmp.lt.s32.totalorder %s14_s7, %s14_s7 }
   0x4   :  { %p89_p0 = scmp.ne.s32.totalorder %s14_s7, %s88_s8  ;;  %p94_p2 = scmp.lt.s32.totalorder %s88_s8, %s88_s8 }
   0x6   :  { %p95_p3 = por %p94_p2, %p93_p1 }
   0x8   :  { %p96_p4 = pnand %p95_p3, %p89_p0 }
   0xa   :  { %99 = shalt.err (!%p96_p4)
}
   0xb   :  { %s125_s9 = smov 128   ;;  %s126_s10 = smov 8  }
   0xc   :  { %19 = dma.hbm_to_vmem [thread:$0]  %s150_s0, 896, %s14_s7, [#allocation3], %s125_s9, %s125_s9, %s126_s10  }
   0xd   :  { %120 = dma.done.wait [#allocation3], 896  }
   0xe   :  { %121 = vsyncadd [#allocation3], 4294966400  ;;  %v23_v0 = vld [vmem:[#allocation2] sm:$0xff]  ;;  %v24_v1 = vld [vmem:[#allocation2 + $0x8] sm:$0xff]  ;;  %vm37_vm0 = vcmask 654336   ;;  %vm49_vm1 = vcmask 648192  }
   0xf   :  { %v25_v2 = vld [vmem:[#allocation2 + $0x10] sm:$0xff]  ;;  %v26_v3 = vld [vmem:[#allocation2 + $0x18] sm:$0xff]  ;;  %v27_v4 = vld [vmem:[#allocation2 + $0x20] sm:$0xff]  ;;  %v30_v5 = vmax.f32 %v23_v0, 0.0  ;;  %v31_v6 = vmax.f32 %v24_v1, 0.0  ;;  %s127_s0 = smov [#allocation5]  }
  0x10   :  { %v32_v7 = vmax.f32 %v25_v2, 0.0  ;;  %v28_v8 = vld [vmem:[#allocation2 + $0x28] sm:$0xff]  ;;  %v33_v9 = vmax.f32 %v26_v3, 0.0  ;;  %v34_v10 = vmax.f32 %v27_v4, 0.0  ;;  %v29_v14 = vld [vmem:[#allocation2 + $0x30] sm:$0x3] }
  0x11   :  { %v38_v11 = vsel %vm37_vm0, %v30_v5, 0.0  ;;  %v39_v12 = vsel %vm37_vm0, %v31_v6, 0.0  ;;  %v35_v16 = vmax.f32 %v28_v8, 0.0  ;;  %v36_v19 = vmax.f32 %v29_v14, 0.0  ;;  %s67_s13 = sshll.u32 %s127_s0, 4  ;;  %s68_s13 = int_to_ptr.vmem [resolvable:$true] %s67_s13 }
  0x12   :  { %v41_v13 = vsel %vm37_vm0, %v32_v7, 0.0  ;;  %v40_v15 = vadd.f32 %v39_v12, %v38_v11  ;;  %v43_v17 = vsel %vm37_vm0, %v33_v9, 0.0  ;;  %v45_v20 = vsel %vm37_vm0, %v34_v10, 0.0  ;;  %s100_s14 = scalar_lea.vmem %s68_s13, 16  ;;  %s104_s15 = scalar_lea.vmem %s68_s13, 32 }
  0x13   :  { %v47_v22 = vsel %vm37_vm0, %v35_v16, 0.0  ;;  %v50_v24 = vsel %vm49_vm1, %v36_v19, 0.0  ;;  %vm59_vm2 = vcmask 647168   ;;  %p101_p5 = scmp.ne.s32.totalorder %s68_s13, %s100_s14  ;;  %p105_p6 = scmp.lt.s32.totalorder %s68_s13, %s68_s13 }
  0x14   :  { %v42_v18 = vadd.f32 %v41_v13, %v40_v15  ;;  %p106_p7 = scmp.lt.s32.totalorder %s104_s15, %s100_s14 }
  0x16   :  { %v44_v21 = vadd.f32 %v43_v17, %v42_v18  ;;  %p107_p8 = por %p106_p7, %p105_p6 }
  0x18   :  { %v46_v23 = vadd.f32 %v45_v20, %v44_v21  ;;  %p108_p9 = pnand %p107_p8, %p101_p5 }
  0x1a   :  { %v48_v25 = vadd.f32 %v47_v22, %v46_v23 }
  0x1c   :  { %v51_v26 = vadd.f32 %v50_v24, %v48_v25 }
  0x1e   :  { %v52_v27 = vrot.slane %v51_v26, 4 }
  0x20   :  { %v53_v28 = vadd.f32 %v52_v27, %v51_v26 }
  0x22   :  { %v54_v29 = vrot.slane %v53_v28, 2 }
  0x24   :  { %v55_v30 = vadd.f32 %v54_v29, %v53_v28 }
  0x26   :  { %v56_v31 = vrot.slane %v55_v30, 1 }
  0x28   :  { %v57_v32 = vadd.f32 %v56_v31, %v55_v30 }
  0x2a   :  { %v58_v33 = vmul.f32 0.02, %v57_v32 }
  0x2c   :  { %60 = vst.msk [vmem:[#allocation5] sm:$0x1] %vm59_vm2, %v58_v33 }
  0x2d   :  { %111 = shalt.err (!%p108_p9)
}
  0x2e   :  { %70 = dma.vmem_to_hbm [thread:$0]  %s68_s13, 16, %s151_s1, [#allocation4]  }
  0x2f   :  { %122 = dma.done.wait [#allocation4], 16  }
  0x30   :  { %123 = vsyncadd [#allocation4], 4294967280 }
  0x31   :  { %74 = vsyncpa [#allocation3], 1 }
  0x32   :  { %75 = vsyncpa [#allocation4], 1 }

</bundles_post_ra>
